<compile_context>
chip_gen: v7x
topology: tpu7x:2x2x1
jax: 0.10.0
libtpu: 0.0.40
codegen_flags: <defaults>
</compile_context>

<pallas_src>
import functools

import jax
import jax.numpy as jnp
import numpy as np
from jax.experimental import pallas as pl
from jax.experimental.pallas import tpu as pltpu

_INV_SQRT2 = 0.7071067811865476


def _round_up(a, b):
    return (a + b - 1) // b * b


def _erf_poly(x):
    """Abramowitz & Stegun 7.1.26 erf approximation, |error| <= 1.5e-7 (f32)."""
    a1, a2, a3, a4, a5 = (0.254829592, -0.284496736, 1.421413741,
                          -1.453152027, 1.061405429)
    p = 0.3275911
    sgn = jnp.where(x >= 0.0, 1.0, -1.0)
    ax = jnp.abs(x)
    t = 1.0 / (1.0 + p * ax)
    poly = ((((a5 * t + a4) * t + a3) * t + a2) * t + a1) * t
    return sgn * (1.0 - poly * jnp.exp(-ax * ax))


def _gelu_exact_kernelside(x):
    # torch.nn.GELU() default: 0.5 * x * (1 + erf(x / sqrt(2)))
    return 0.5 * x * (1.0 + _erf_poly(x * _INV_SQRT2))


# --------------------------- Pallas kernel ----------------------------------

def _mlp_kernel(x_ref, w1_ref, b1_ref, w2_ref, b2_ref, o_ref):
    # fc1 on the MXU, f32 accumulation.
    h = jnp.dot(x_ref[...], w1_ref[...], preferred_element_type=jnp.float32)
    h = h + b1_ref[...].astype(jnp.float32)
    # exact GELU (erf), computed in f32 on VPU + EUP.
    h = _gelu_exact_kernelside(h)
    # fc2 on the MXU; cast hidden back to weight dtype (bf16-friendly on v6e/v7x).
    y = jnp.dot(h.astype(w2_ref.dtype), w2_ref[...],
                preferred_element_type=jnp.float32)
    y = y + b2_ref[...].astype(jnp.float32)
    o_ref[...] = y.astype(o_ref.dtype)


def mlp_pallas(x2d, w1, b1, w2, b2, *, tm=512):
    """y = gelu(x2d @ w1 + b1) @ w2 + b2, fused into one pallas_call."""
    M, D = x2d.shape
    Dh = w1.shape[1]
    Do = w2.shape[1]

    # Row tile: large for HBM efficiency, sublane-aligned, and small enough
    # that the grid has >=2 parallel steps whenever possible (v7x megacore).
    tm_eff = max(8, min(tm, _round_up(M, 16) // 2))
    tm_eff = _round_up(tm_eff, 8)
    Mp = _round_up(M, tm_eff)
    if Mp != M:
        x2d = jnp.pad(x2d, ((0, Mp - M), (0, 0)))

    out = pl.pallas_call(
        _mlp_kernel,
        out_shape=jax.ShapeDtypeStruct((Mp, Do), x2d.dtype),
        grid=(Mp // tm_eff,),
        in_specs=[
            pl.BlockSpec((tm_eff, D), lambda i: (i, 0)),
            pl.BlockSpec((D, Dh), lambda i: (0, 0)),   # resident across grid
            pl.BlockSpec((1, Dh), lambda i: (0, 0)),
            pl.BlockSpec((Dh, Do), lambda i: (0, 0)),  # resident across grid
            pl.BlockSpec((1, Do), lambda i: (0, 0)),
        ],
        out_specs=pl.BlockSpec((tm_eff, Do), lambda i: (i, 0)),
        compiler_params=pltpu.CompilerParams(
            dimension_semantics=("parallel",),
            vmem_limit_bytes=48 * 1024 * 1024),
    )(x2d, w1, b1.reshape(1, Dh), w2, b2.reshape(1, Do))
    return out[:M]


# --------------------------- Forward pass ------------------------------------

def mlp_forward(x, params, *, use_pallas=True):
    """x: (B, N, dim) tokens -> (B, N, dim)."""
    B, N, D = x.shape
    x2d = x.reshape(B * N, D)
    if use_pallas:
        y = mlp_pallas(x2d, params["w1"], params["b1"],
                       params["w2"], params["b2"])
    else:
        # pure-JAX reference (exact erf GELU, HIGHEST-precision dots).
        h = jnp.dot(x2d, params["w1"], preferred_element_type=jnp.float32,
                    precision=jax.lax.Precision.HIGHEST)
        h = h + params["b1"].astype(jnp.float32)
        h = 0.5 * h * (1.0 + jax.scipy.special.erf(h * _INV_SQRT2))
        y = jnp.dot(h.astype(params["w2"].dtype), params["w2"],
                    preferred_element_type=jnp.float32,
                    precision=jax.lax.Precision.HIGHEST)
        y = (y + params["b2"].astype(jnp.float32)).astype(x.dtype)
    return y.reshape(B, N, D)


# --------------------------- Driver ------------------------------------------

if __name__ == "__main__":
    B, N, dim, mlp_ratio = 2, 128, 32, 4
    hidden = dim * mlp_ratio

    root = jax.random.PRNGKey(0)
    kx, k1, k2, k3, k4 = jax.random.split(root, 5)

    x = jax.random.normal(kx, (B, N, dim), jnp.float32)
    params = dict(
        w1=jax.random.normal(k1, (dim, hidden), jnp.float32) * 0.1,
        b1=jax.random.normal(k2, (hidden,), jnp.float32) * 0.1,
        w2=jax.random.normal(k3, (hidden, dim), jnp.float32) * 0.1,
        b2=jax.random.normal(k4, (dim,), jnp.float32) * 0.1,
    )

    fwd = jax.jit(functools.partial(mlp_forward, use_pallas=True))
    out = fwd(x, params)
    jax.block_until_ready(out)
    assert out.shape == (B, N, dim)

    # correctness spot-check against the pure-JAX exact-GELU reference
    ref = mlp_forward(x, params, use_pallas=False)
    np.testing.assert_allclose(np.asarray(out), np.asarray(ref),
                               rtol=1e-4, atol=1e-4)

    print("KERNEL_OK")
</pallas_src>

<mosaic_0001>
module attributes {stable_mosaic.version = 11 : i64} {
  func.func @_mlp_kernel(%arg0: i32, %arg1: memref<128x32xf32, #tpu.memory_space<vmem>>, %arg2: memref<32x128xf32, #tpu.memory_space<vmem>>, %arg3: memref<1x128xf32, #tpu.memory_space<vmem>>, %arg4: memref<128x32xf32, #tpu.memory_space<vmem>>, %arg5: memref<1x32xf32, #tpu.memory_space<vmem>>, %arg6: memref<128x32xf32, #tpu.memory_space<vmem>>) attributes {dimension_semantics = [#tpu.dimension_semantics<parallel>], iteration_bounds = array<i64: 2>, scalar_prefetch = 0 : i64, scratch_operands = 0 : i64, tpu.core_type = #tpu.core_type<tc>, window_params = [{transform_indices = @transform_0, window_bounds = array<i64: 128, 32>}, {pipeline_mode = #tpu.pipeline_mode<synchronous>, transform_indices = @transform_1, window_bounds = array<i64: 32, 128>}, {pipeline_mode = #tpu.pipeline_mode<synchronous>, transform_indices = @transform_2, window_bounds = array<i64: 1, 128>}, {pipeline_mode = #tpu.pipeline_mode<synchronous>, transform_indices = @transform_3, window_bounds = array<i64: 128, 32>}, {pipeline_mode = #tpu.pipeline_mode<synchronous>, transform_indices = @transform_4, window_bounds = array<i64: 1, 32>}, {transform_indices = @transform_5, window_bounds = array<i64: 128, 32>}]} {
    %c0 = arith.constant 0 : index
    %c0_0 = arith.constant 0 : index
    %0 = vector.load %arg1[%c0, %c0_0] : memref<128x32xf32, #tpu.memory_space<vmem>>, vector<128x32xf32>
    %c0_1 = arith.constant 0 : index
    %c0_2 = arith.constant 0 : index
    %1 = vector.load %arg2[%c0_1, %c0_2] : memref<32x128xf32, #tpu.memory_space<vmem>>, vector<32x128xf32>
    %cst = arith.constant dense<0.000000e+00> : vector<128x128xf32>
    %2 = tpu.matmul %0, %1, %cst {dimension_numbers = #tpu.dot_dimension_numbers<[1], [0], [0], [1], [0, 0, 1, 1], [], []>} : vector<128x32xf32>, vector<32x128xf32>, vector<128x128xf32> -> vector<128x128xf32>
    %c0_3 = arith.constant 0 : index
    %c0_4 = arith.constant 0 : index
    %3 = vector.load %arg3[%c0_3, %c0_4] : memref<1x128xf32, #tpu.memory_space<vmem>>, vector<1x128xf32>
    %4 = vector.broadcast %3 : vector<1x128xf32> to vector<128x128xf32>
    %5 = arith.addf %2, %4 : vector<128x128xf32>
    %cst_5 = arith.constant 5.000000e-01 : f32
    %6 = vector.broadcast %cst_5 : f32 to vector<128x128xf32>
    %7 = arith.mulf %6, %5 : vector<128x128xf32>
    %cst_6 = arith.constant 0.707106769 : f32
    %8 = vector.broadcast %cst_6 : f32 to vector<128x128xf32>
    %9 = arith.mulf %5, %8 : vector<128x128xf32>
    %cst_7 = arith.constant 0.000000e+00 : f32
    %10 = vector.broadcast %cst_7 : f32 to vector<128x128xf32>
    %11 = arith.cmpf oge, %9, %10 : vector<128x128xf32>
    %cst_8 = arith.constant 1.000000e+00 : f32
    %cst_9 = arith.constant -1.000000e+00 : f32
    %12 = vector.broadcast %cst_8 : f32 to vector<128x128xf32>
    %13 = vector.broadcast %cst_9 : f32 to vector<128x128xf32>
    %14 = arith.select %11, %12, %13 : vector<128x128xi1>, vector<128x128xf32>
    %15 = math.absf %9 : vector<128x128xf32>
    %cst_10 = arith.constant 0.327591091 : f32
    %16 = vector.broadcast %cst_10 : f32 to vector<128x128xf32>
    %17 = arith.mulf %16, %15 : vector<128x128xf32>
    %cst_11 = arith.constant 1.000000e+00 : f32
    %18 = vector.broadcast %cst_11 : f32 to vector<128x128xf32>
    %19 = arith.addf %18, %17 : vector<128x128xf32>
    %cst_12 = arith.constant 1.000000e+00 : f32
    %20 = vector.broadcast %cst_12 : f32 to vector<128x128xf32>
    %21 = arith.divf %20, %19 : vector<128x128xf32>
    %cst_13 = arith.constant 1.06140542 : f32
    %22 = vector.broadcast %cst_13 : f32 to vector<128x128xf32>
    %23 = arith.mulf %22, %21 : vector<128x128xf32>
    %cst_14 = arith.constant -1.45315206 : f32
    %24 = vector.broadcast %cst_14 : f32 to vector<128x128xf32>
    %25 = arith.addf %23, %24 : vector<128x128xf32>
    %26 = arith.mulf %25, %21 : vector<128x128xf32>
    %cst_15 = arith.constant 1.42141378 : f32
    %27 = vector.broadcast %cst_15 : f32 to vector<128x128xf32>
    %28 = arith.addf %26, %27 : vector<128x128xf32>
    %29 = arith.mulf %28, %21 : vector<128x128xf32>
    %cst_16 = arith.constant -0.284496725 : f32
    %30 = vector.broadcast %cst_16 : f32 to vector<128x128xf32>
    %31 = arith.addf %29, %30 : vector<128x128xf32>
    %32 = arith.mulf %31, %21 : vector<128x128xf32>
    %cst_17 = arith.constant 0.254829586 : f32
    %33 = vector.broadcast %cst_17 : f32 to vector<128x128xf32>
    %34 = arith.addf %32, %33 : vector<128x128xf32>
    %35 = arith.mulf %34, %21 : vector<128x128xf32>
    %cst_18 = arith.constant 0.000000e+00 : f32
    %36 = vector.broadcast %cst_18 : f32 to vector<128x128xf32>
    %37 = arith.subf %36, %15 : vector<128x128xf32>
    %38 = arith.mulf %37, %15 : vector<128x128xf32>
    %39 = math.exp %38 : vector<128x128xf32>
    %40 = arith.mulf %35, %39 : vector<128x128xf32>
    %cst_19 = arith.constant 1.000000e+00 : f32
    %41 = vector.broadcast %cst_19 : f32 to vector<128x128xf32>
    %42 = arith.subf %41, %40 : vector<128x128xf32>
    %43 = arith.mulf %14, %42 : vector<128x128xf32>
    %cst_20 = arith.constant 1.000000e+00 : f32
    %44 = vector.broadcast %cst_20 : f32 to vector<128x128xf32>
    %45 = arith.addf %44, %43 : vector<128x128xf32>
    %46 = arith.mulf %7, %45 : vector<128x128xf32>
    %c0_21 = arith.constant 0 : index
    %c0_22 = arith.constant 0 : index
    %47 = vector.load %arg4[%c0_21, %c0_22] : memref<128x32xf32, #tpu.memory_space<vmem>>, vector<128x32xf32>
    %cst_23 = arith.constant dense<0.000000e+00> : vector<128x32xf32>
    %48 = tpu.matmul %46, %47, %cst_23 {dimension_numbers = #tpu.dot_dimension_numbers<[1], [0], [0], [1], [0, 0, 1, 1], [], []>} : vector<128x128xf32>, vector<128x32xf32>, vector<128x32xf32> -> vector<128x32xf32>
    %c0_24 = arith.constant 0 : index
    %c0_25 = arith.constant 0 : index
    %49 = vector.load %arg5[%c0_24, %c0_25] : memref<1x32xf32, #tpu.memory_space<vmem>>, vector<1x32xf32>
    %50 = vector.broadcast %49 : vector<1x32xf32> to vector<128x32xf32>
    %51 = arith.addf %48, %50 : vector<128x32xf32>
    %c0_26 = arith.constant 0 : index
    %c0_27 = arith.constant 0 : index
    %52 = vector.load %arg6[%c0_26, %c0_27] : memref<128x32xf32, #tpu.memory_space<vmem>>, vector<128x32xf32>
    tpu.vector_store %arg6[%c0_26, %c0_27], %51 {strides = array<i32>} : memref<128x32xf32, #tpu.memory_space<vmem>>, vector<128x32xf32>,
    return
  }
  func.func @transform_0(%arg0: i32) -> (i32, i32) {
    %c0_i32 = arith.constant 0 : i32
    %c0_i32_0 = arith.constant 0 : i32
    return %arg0, %c0_i32 : i32, i32
  }
  func.func @transform_1(%arg0: i32) -> (i32, i32) {
    %c0_i32 = arith.constant 0 : i32
    %c0_i32_0 = arith.constant 0 : i32
    %c0_i32_1 = arith.constant 0 : i32
    return %c0_i32, %c0_i32_0 : i32, i32
  }
  func.func @transform_2(%arg0: i32) -> (i32, i32) {
    %c0_i32 = arith.constant 0 : i32
    %c0_i32_0 = arith.constant 0 : i32
    %c0_i32_1 = arith.constant 0 : i32
    return %c0_i32, %c0_i32_0 : i32, i32
  }
  func.func @transform_3(%arg0: i32) -> (i32, i32) {
    %c0_i32 = arith.constant 0 : i32
    %c0_i32_0 = arith.constant 0 : i32
    %c0_i32_1 = arith.constant 0 : i32
    return %c0_i32, %c0_i32_0 : i32, i32
  }
  func.func @transform_4(%arg0: i32) -> (i32, i32) {
    %c0_i32 = arith.constant 0 : i32
    %c0_i32_0 = arith.constant 0 : i32
    %c0_i32_1 = arith.constant 0 : i32
    return %c0_i32, %c0_i32_0 : i32, i32
  }
  func.func @transform_5(%arg0: i32) -> (i32, i32) {
    %c0_i32 = arith.constant 0 : i32
    %c0_i32_0 = arith.constant 0 : i32
    return %arg0, %c0_i32 : i32, i32
  }
}

</mosaic_0001>

<bundles_post_ra>
// kernel: mlp_forward.1
= control target key start
LH: loop header
LB: loop body
LE: loop exit
PB: predicated region body
PF: predicated region fallthrough
CT: control target
= control target key end

     0   :  { %s1458_s18 = smov 0   ;;  %s1990_s0 = inlined_call_operand.vmem [shape: f32[256,32], index: 0, kind: input, shape index: {}]   ;;  %s1991_s1 = inlined_call_operand.vmem [shape: f32[32,128], index: 1, kind: input, shape index: {}]   ;;  %s1992_s2 = inlined_call_operand.vmem [shape: f32[1,128], index: 2, kind: input, shape index: {}]   ;;  %s1993_s3 = inlined_call_operand.vmem [shape: f32[128,32], index: 3, kind: input, shape index: {}]   ;;  %s1994_s4 = inlined_call_operand.vmem [shape: f32[1,32], index: 4, kind: input, shape index: {}]   ;;  %s1995_s5 = inlined_call_operand.vmem [shape: f32[256,32], index: 5, kind: output, shape index: {}]  }
   0x1 LB: > { %s1121_s19 = sadd.s32 4294967295, %s1425_s18   ;;  %p1125_p0 = scmp.ge.s32.totalorder %s1425_s18, 1  ;;  %s1425_s18 = sphi %s1458_s18, %s15_s18  }
   0x2   : > { %p188_p1 = scmp.lt.s32.totalorder %s1425_s18, 3 }
   0x4   : > { %p189_p2 = pnand %p1125_p0, %p188_p1 }
   0x6   : > { %192 = sbr.rel (%p189_p2) target bundleno = 571 (0x23b), region = 40 }
   0xd   : > { %v244_v0 = vld [vmem:[%s1991_s1] sm:$0xff]  ;;  %v245_v1 = vld [vmem:[%s1991_s1 + $0x8] sm:$0xff]  ;;  %v246_v2 = vld [vmem:[%s1991_s1 + $0x10] sm:$0xff]  ;;  %s1126_s26 = sshll.u32 %s1121_s19, 4  ;;  %vm255_vm0 = vcmask 261120  }
   0xe   : > { %v1290_v3 = vpack.c.bf16 %v245_v1, %v244_v0  ;;  %v247_v4 = vld [vmem:[%s1991_s1 + $0x18] sm:$0xff]  ;;  %p217_p3 = scmp.lt.s32.totalorder %s1126_s26, 31  ;;  %v881_v22 = vld [vmem:[%s1993_s3] sm:$0xff]  ;;  %v882_v23 = vld [vmem:[%s1993_s3 + $0x8] sm:$0xff] }
   0xf   : > { %v1294_v5 = vpack.c.bf16 %v247_v4, %v246_v2  ;;  %v1298_v24 = vpack.c.bf16 %v882_v23, %v881_v22  ;;  %v883_v25 = vld [vmem:[%s1993_s3 + $0x10] sm:$0xff]  ;;  %v884_v26 = vld [vmem:[%s1993_s3 + $0x18] sm:$0xff]  ;;  %v885_v28 = vld [vmem:[%s1993_s3 + $0x20] sm:$0xff] }
  0x10   : > { %1291 = vmatprep.subr.bf16.mxu0 %v1290_v3  ;;  %s2039_s26 = smov (!%p217_p3, %s1126_s26), 31  ;;  %v1302_v27 = vpack.c.bf16 %v884_v26, %v883_v25  ;;  %v886_v29 = vld [vmem:[%s1993_s3 + $0x28] sm:$0xff]  ;;  %v887_v31 = vld [vmem:[%s1993_s3 + $0x30] sm:$0xff]  ;;  %v888_v32 = vld [vmem:[%s1993_s3 + $0x38] sm:$0xff] }
  0x11   : > { %1293 = vmatpush3.bf16.msra.mxu0 %v1290_v3  ;;  %s1127_s29 = sshll.u32 %s2039_s26, 3  ;;  %1330 = vmatprep.subr.bf16.mxu1 %v1298_v24  ;;  %v1306_v30 = vpack.c.bf16 %v886_v29, %v885_v28  ;;  %v1310_v33 = vpack.c.bf16 %v888_v32, %v887_v31  ;;  %v889_v34 = vld [vmem:[%s1993_s3 + $0x40] sm:$0xff]  ;;  %v890_v35 = vld [vmem:[%s1993_s3 + $0x48] sm:$0xff]  ;;  %v891_v37 = vld [vmem:[%s1993_s3 + $0x50] sm:$0xff] }
  0x12   : > { %1295 = vmatprep.subr.bf16.mxu0 %v1294_v5  ;;  %s1486_s7 = scalar_lea.vmem %s1990_s0, %s1127_s29  ;;  %1338 = vmatpush3.bf16.msra.mxu1 %v1298_v24  ;;  %v1314_v36 = vpack.c.bf16 %v890_v35, %v889_v34  ;;  %v892_v38 = vld [vmem:[%s1993_s3 + $0x58] sm:$0xff]  ;;  %v893_v40 = vld [vmem:[%s1993_s3 + $0x60] sm:$0xff]  ;;  %v894_v41 = vld [vmem:[%s1993_s3 + $0x68] sm:$0xff]  ;;  %s1953_s25 = scalar_lea.vmem %s1995_s5, %s1127_s29 }
  0x13   : > { %v228_v6 = vld [vmem:[%s1486_s7] sm:$0xff]  ;;  %v229_v7 = vld [vmem:[%s1486_s7 + $0x8] sm:$0xff]  ;;  %v230_v8 = vld [vmem:[%s1486_s7 + $0x10] sm:$0xff]  ;;  %1331 = vmatprep.subr.bf16.mxu1 %v1302_v27  ;;  %v1318_v39 = vpack.c.bf16 %v892_v38, %v891_v37  ;;  %v1322_v43 = vpack.c.bf16 %v894_v41, %v893_v40 }
  0x14   : > { %1210 = vmatprep.mubr.msk.f32.mxu0 %vm255_vm0, %v228_v6  ;;  %v231_v9 = vld [vmem:[%s1486_s7 + $0x18] sm:$0xff]  ;;  %v232_v10 = vld [vmem:[%s1486_s7 + $0x20] sm:$0xff]  ;;  %v233_v11 = vld [vmem:[%s1486_s7 + $0x28] sm:$0xff] }
  0x15   : > { %1297 = vmatpush3.bf16.msra.mxu0 %v1294_v5  ;;  %v234_v12 = vld [vmem:[%s1486_s7 + $0x30] sm:$0xff]  ;;  %v235_v13 = vld [vmem:[%s1486_s7 + $0x38] sm:$0xff]  ;;  %v236_v14 = vld [vmem:[%s1486_s7 + $0x40] sm:$0xff] }
  0x16   : > { %v237_v15 = vld [vmem:[%s1486_s7 + $0x48] sm:$0xff]  ;;  %v238_v16 = vld [vmem:[%s1486_s7 + $0x50] sm:$0xff]  ;;  %v239_v17 = vld [vmem:[%s1486_s7 + $0x58] sm:$0xff]  ;;  %1299 = vmatprep.subr.bf16.mxu0 %v1298_v24  ;;  %1339 = vmatpush3.bf16.msra.mxu1 %v1302_v27 }
  0x17   : > { %v240_v18 = vld [vmem:[%s1486_s7 + $0x60] sm:$0xff]  ;;  %v241_v19 = vld [vmem:[%s1486_s7 + $0x68] sm:$0xff]  ;;  %v242_v20 = vld [vmem:[%s1486_s7 + $0x70] sm:$0xff]  ;;  %1332 = vmatprep.subr.bf16.mxu1 %v1306_v30 }
  0x18   : > { %1211 = vmatmul.mubr.msk.f32.vlgmr.msra.gmra.mrb[0].mxu0 %vm255_vm0, %v229_v7  ;;  %v243_v21 = vld [vmem:[%s1486_s7 + $0x78] sm:$0xff]  ;;  %v895_v42 = vld [vmem:[%s1993_s3 + $0x70] sm:$0xff]  ;;  %v1571_v46 = vld [vmem:[%s1992_s2] ss:$0 sm:$0xff] }
  0x19   : > { %1213 = vmatprep.mubr.msk.f32.mxu0 %vm255_vm0, %v230_v8  ;;  %1301 = vmatpush3.bf16.msra.mxu0 %v1298_v24  ;;  %v896_v44 = vld [vmem:[%s1993_s3 + $0x78] sm:$0xff] }
  0x1a   : > { %1303 = vmatprep.subr.bf16.mxu0 %v1302_v27  ;;  %1340 = vmatpush3.bf16.msra.mxu1 %v1306_v30  ;;  %v1326_v45 = vpack.c.bf16 %v896_v44, %v895_v42 }
  0x1b   : > { %1333 = vmatprep.subr.bf16.mxu1 %v1310_v33 }
  0x1c   : > { %1214 = vmatmul.mubr.msk.f32.gmra.mrb[2].mxu0 %vm255_vm0, %v231_v9 }
  0x1d   : > { %1216 = vmatprep.mubr.msk.f32.mxu0 %vm255_vm0, %v232_v10  ;;  %1305 = vmatpush3.bf16.msra.mxu0 %v1302_v27 }
  0x1e   : > { %1307 = vmatprep.subr.bf16.mxu0 %v1306_v30  ;;  %1341 = vmatpush3.bf16.msra.mxu1 %v1310_v33 }
  0x1f   : > { %1334 = vmatprep.subr.bf16.mxu1 %v1314_v36 }
  0x20   : > { %1217 = vmatmul.mubr.msk.f32.gmra.mrb[4].mxu0 %vm255_vm0, %v233_v11 }
  0x21   : > { %1219 = vmatprep.mubr.msk.f32.mxu0 %vm255_vm0, %v234_v12  ;;  %1309 = vmatpush3.bf16.msra.mxu0 %v1306_v30 }
  0x22   : > { %1311 = vmatprep.subr.bf16.mxu0 %v1310_v33  ;;  %1342 = vmatpush3.bf16.msra.mxu1 %v1314_v36 }
  0x23   : > { %1335 = vmatprep.subr.bf16.mxu1 %v1318_v39 }
  0x24   : > { %1220 = vmatmul.mubr.msk.f32.gmra.mrb[6].mxu0 %vm255_vm0, %v235_v13 }
  0x25   : > { %1222 = vmatprep.mubr.msk.f32.mxu0 %vm255_vm0, %v236_v14  ;;  %1313 = vmatpush3.bf16.msra.mxu0 %v1310_v33 }
  0x26   : > { %1315 = vmatprep.subr.bf16.mxu0 %v1314_v36  ;;  %1343 = vmatpush3.bf16.msra.mxu1 %v1318_v39 }
  0x27   : > { %1336 = vmatprep.subr.bf16.mxu1 %v1322_v43 }
  0x28   : > { %1223 = vmatmul.mubr.msk.f32.gmra.mrb[8].mxu0 %vm255_vm0, %v237_v15 }
  0x29   : > { %1225 = vmatprep.mubr.msk.f32.mxu0 %vm255_vm0, %v238_v16  ;;  %1317 = vmatpush3.bf16.msra.mxu0 %v1314_v36 }
  0x2a   : > { %1319 = vmatprep.subr.bf16.mxu0 %v1318_v39  ;;  %1344 = vmatpush3.bf16.msra.mxu1 %v1322_v43 }
  0x2b   : > { %1337 = vmatprep.subr.bf16.mxu1 %v1326_v45 }
  0x2c   : > { %1226 = vmatmul.mubr.msk.f32.gmra.mrb[10].mxu0 %vm255_vm0, %v239_v17 }
  0x2d   : > { %1228 = vmatprep.mubr.msk.f32.mxu0 %vm255_vm0, %v240_v18  ;;  %1321 = vmatpush3.bf16.msra.mxu0 %v1318_v39  ;;  %v1997_v18 = vmov -1.0  }
  0x2e   : > { %1323 = vmatprep.subr.bf16.mxu0 %v1322_v43  ;;  %1345 = vmatpush3.bf16.msra.mxu1 %v1326_v45 }
  0x30   : > { %1229 = vmatmul.mubr.msk.f32.gmra.mrb[12].mxu0 %vm255_vm0, %v241_v19 }
  0x31   : > { %1231 = vmatprep.mubr.msk.f32.mxu0 %vm255_vm0, %v242_v20  ;;  %1325 = vmatpush3.bf16.msra.mxu0 %v1322_v43 }
  0x32   : > { %1327 = vmatprep.subr.bf16.mxu0 %v1326_v45 }
  0x34   : > { %1232 = vmatmul.mubr.msk.f32.gmra.mrb[14].mxu0 %vm255_vm0, %v243_v21 }
  0x35   : > { %1329 = vmatpush3.bf16.msra.mxu0 %v1326_v45 }
  0xeb   : > { %v1212_v47 = vpop.f32.mrb[0].mxu0 }
  0xec   : > { %v376_v48 = vadd.f32 %v1212_v47, %v1571_v46  ;;  %v370_v49 = vpop.f32.mrb[1].mxu0 }
  0xed   : > { %v371_v50 = vadd.f32 %v1571_v46, %v370_v49 }
  0xee   : > { %v466_v51 = vmul.f32 0.70710677, %v376_v48  ;;  %v1579_v11 = vmul.f32 0.5, %v376_v48 }
  0xef   : > { %v465_v52 = vmul.f32 0.70710677, %v371_v50  ;;  %v1215_v53 = vpop.f32.mrb[2].mxu0  ;;  %v1588_v20 = vmul.f32 0.5, %v371_v50 }
  0xf0   : > { %v514_v54 = vand.u32 2147483647, %v466_v51  ;;  %v386_v55 = vadd.f32 %v1215_v53, %v1571_v46  ;;  %v380_v56 = vpop.f32.mrb[3].mxu0  ;;  %vm482_vm1 = vcmp.ge.f32.partialorder %v466_v51, 0.0 }
  0xf1   : > { %v381_v57 = vadd.f32 %v1571_v46, %v380_v56  ;;  %v513_v59 = vand.u32 2147483647, %v465_v52  ;;  %vm481_vm2 = vcmp.ge.f32.partialorder %v465_v52, 0.0  ;;  %v1586_v19 = vsel %vm482_vm1, 1.0, %v1997_v18 }
  0xf2   : > { %v530_v58 = vmul.f32 0.3275911, %v514_v54  ;;  %v468_v60 = vmul.f32 0.70710677, %v386_v55  ;;  %v738_v2 = vsub.f32 0.0, %v514_v54  ;;  %v1591_v24 = vsel %vm481_vm2, 1.0, %v1997_v18 }
  0xf3   : > { %v1218_v62 = vpop.f32.mrb[4].mxu0  ;;  %v467_v0 = vmul.f32 0.70710677, %v381_v57  ;;  %v529_v3 = vmul.f32 0.3275911, %v513_v59  ;;  %v737_v4 = vsub.f32 0.0, %v513_v59 }
  0xf4   : > { %v546_v61 = vadd.f32 1.0, %v530_v58  ;;  %v516_v63 = vand.u32 2147483647, %v468_v60  ;;  %v390_v1 = vpop.f32.mrb[5].mxu0  ;;  %v396_v7 = vadd.f32 %v1218_v62, %v1571_v46  ;;  %v754_v12 = vmul.f32 %v738_v2, %v514_v54 }
  0xf5   : > { %v515_v9 = vand.u32 2147483647, %v467_v0  ;;  %v391_v10 = vadd.f32 %v1571_v46, %v390_v1  ;;  %v545_v14 = vadd.f32 1.0, %v529_v3  ;;  %v753_v15 = vmul.f32 %v737_v4, %v513_v59 }
  0xf6   : > { %1355 = vrcp.f32 %v546_v61  ;;  %v740_v6 = vsub.f32 0.0, %v516_v63  ;;  %v1581_v13 = vmul.f32 0.70710677, %v396_v7  ;;  %vm484_vm3 = vcmp.ge.f32.partialorder %v468_v60, 0.0 }
  0xf7   : > { %v1221_v5 = vpop.f32.mrb[6].mxu0  ;;  %v1583_v16 = vmul.f32 0.70710677, %v391_v10  ;;  %v532_v21 = vmul.f32 0.3275911, %v516_v63  ;;  %v1593_v25 = vmul.f32 0.5, %v386_v55  ;;  %1357 = vrcp.f32 %v545_v14 }
  0xf8   : > { %v400_v8 = vpop.f32.mrb[7].mxu0  ;;  %v756_v22 = vmul.f32 %v740_v6, %v516_v63  ;;  %v739_v26 = vsub.f32 0.0, %v515_v9  ;;  %v518_v27 = vand.u32 2147483647, %v1581_v13  ;;  %v771_v28 = vmul.f32 1.442695, %v754_v12 }
  0xf9   : > { %v1597_v29 = vsel %vm484_vm3, 1.0, %v1997_v18  ;;  %v1599_v30 = vmul.f32 0.5, %v381_v57  ;;  %v517_v31 = vand.u32 2147483647, %v1583_v16  ;;  %v769_v32 = vmul.f32 1.442695, %v753_v15 }
  0xfa   : > { %vm483_vm4 = vcmp.ge.f32.partialorder %v467_v0, 0.0  ;;  %v1603_v33 = vadd.f32 %v1221_v5, %v1571_v46  ;;  %v548_v36 = vadd.f32 1.0, %v532_v21  ;;  %v775_v37 = vmul.f32 1.442695, %v756_v22 }
  0xfb   : > { %v1224_v17 = vpop.f32.mrb[8].mxu0  ;;  %v531_v38 = vmul.f32 0.3275911, %v515_v9  ;;  %v1608_v39 = vadd.f32 %v1571_v46, %v400_v8  ;;  %v755_v42 = vmul.f32 %v739_v26, %v515_v9  ;;  %v534_v43 = vmul.f32 0.3275911, %v518_v27 }
  0xfc   : > { %v410_v23 = vpop.f32.mrb[9].mxu0  ;;  %v742_v44 = vsub.f32 0.0, %v518_v27  ;;  %1359 = vpow2.f32 %v771_v28  ;;  %v741_v45 = vsub.f32 0.0, %v517_v31  ;;  %v472_v47 = vmul.f32 0.70710677, %v1603_v33 }
  0xfd   : > { %v1615_v48 = vmul.f32 0.70710677, %v1608_v39  ;;  %v1619_v50 = vsel %vm483_vm4, 1.0, %v1997_v18  ;;  %v533_v51 = vmul.f32 0.3275911, %v517_v31  ;;  %v416_v52 = vadd.f32 %v1224_v17, %v1571_v46 }
  0xfe   : > { %1361 = vpow2.f32 %v769_v32  ;;  %v547_v54 = vadd.f32 1.0, %v531_v38  ;;  %v1624_v55 = vmul.f32 0.5, %v396_v7  ;;  %v520_v56 = vand.u32 2147483647, %v472_v47 }
  0xff   : > { %v1227_v34 = vpop.f32.mrb[10].mxu0  ;;  %1363 = vrcp.f32 %v548_v36  ;;  %v773_v59 = vmul.f32 1.442695, %v755_v42  ;;  %v758_v60 = vmul.f32 %v742_v44, %v518_v27  ;;  %v550_v61 = vadd.f32 1.0, %v534_v43 }
 0x100   : > { %v1605_v35 = vpop.eup %1355  ;;  %v1610_v40 = vpop.f32.mrb[11].mxu0  ;;  %v1629_v62 = vmul.f32 0.5, %v391_v10  ;;  %v757_v63 = vmul.f32 %v741_v45, %v517_v31  ;;  %v519_v0 = vand.u32 2147483647, %v1615_v48  ;;  %1365 = vpow2.f32 %v775_v37 }
 0x101   : > { %v594_v41 = vmul.f32 1.0614054, %v1605_v35  ;;  %v549_v2 = vadd.f32 1.0, %v533_v51  ;;  %v1632_v3 = vmul.f32 0.70710677, %v416_v52  ;;  %1367 = vrcp.f32 %v547_v54  ;;  %v1640_v8 = vpop.eup %1357 }
 0x102   : > { %vm486_vm5 = vcmp.ge.f32.partialorder %v1581_v13, 0.0  ;;  %v744_v5 = vsub.f32 0.0, %v520_v56  ;;  %v411_v6 = vadd.f32 %v1571_v46, %v410_v23  ;;  %1369 = vpow2.f32 %v773_v59 }
 0x103   : > { %v610_v49 = vadd.f32 -1.4531521, %v594_v41  ;;  %v1622_v53 = vpop.f32.mrb[12].mxu0  ;;  %v779_v10 = vmul.f32 1.442695, %v758_v60  ;;  %v1644_v12 = vadd.f32 %v1227_v34, %v1571_v46  ;;  %1371 = vrcp.f32 %v550_v61 }
 0x104   : > { %v1626_v57 = vpop.f32.mrb[13].mxu0  ;;  %vm485_vm6 = vcmp.ge.f32.partialorder %v1583_v16, 0.0  ;;  %v777_v14 = vmul.f32 1.442695, %v757_v63  ;;  %v743_v15 = vsub.f32 0.0, %v519_v0  ;;  %1373 = vrcp.f32 %v549_v2 }
 0x105   : > { %v626_v58 = vmul.f32 %v1605_v35, %v610_v49  ;;  %2006 = vst [vmem:[#allocation2_spill] sm:$0xff] %v1644_v12  ;;  %v536_v21 = vmul.f32 0.3275911, %v520_v56  ;;  %v522_v22 = vand.u32 2147483647, %v1632_v3  ;;  %vm488_vm7 = vcmp.ge.f32.partialorder %v472_v47, 0.0 }
 0x106   : > { %v1360_v23 = vpop.eup %1359  ;;  %v760_v26 = vmul.f32 %v744_v5, %v520_v56  ;;  %v535_v27 = vmul.f32 0.3275911, %v519_v0  ;;  %v1648_v28 = vmul.f32 0.70710677, %v411_v6  ;;  %v1654_v32 = vsel %vm486_vm5, 1.0, %v1997_v18 }
 0x107   : > { %v642_v1 = vadd.f32 1.4214138, %v626_v58  ;;  %v1634_v4 = vpop.f32.mrb[14].mxu0  ;;  %1375 = vpow2.f32 %v779_v10  ;;  %v1657_v34 = vmul.f32 0.70710677, %v1644_v12  ;;  %v1664_v37 = vsel %vm485_vm6, 1.0, %v1997_v18 }
 0x108   : > { %v1638_v7 = vpop.f32.mrb[15].mxu0  ;;  %v1659_v36 = vpop.eup %1361  ;;  %1377 = vpow2.f32 %v777_v14  ;;  %v1667_v38 = vmul.f32 0.5, %v1603_v33  ;;  %v759_v41 = vmul.f32 %v743_v15, %v519_v0  ;;  %v1672_v43 = vsel %vm488_vm7, 1.0, %v1997_v18 }
 0x109   : > { %v658_v9 = vmul.f32 %v1605_v35, %v642_v1  ;;  %v1669_v42 = vpop.eup %1363  ;;  %v552_v44 = vadd.f32 1.0, %v536_v21  ;;  %v746_v45 = vsub.f32 0.0, %v522_v22  ;;  %v783_v47 = vmul.f32 1.442695, %v760_v26 }
 0x10a   : > { %v551_v49 = vadd.f32 1.0, %v535_v27  ;;  %v1674_v51 = vmul.f32 0.5, %v416_v52  ;;  %v521_v16 = vand.u32 2147483647, %v1648_v28  ;;  %v1677_v54 = vpop.eup %1365  ;;  %v538_v56 = vmul.f32 0.3275911, %v522_v22 }
 0x10b   : > { %v674_v17 = vadd.f32 -0.28449672, %v658_v9  ;;  %v524_v58 = vand.u32 2147483647, %v1657_v34  ;;  %v1683_v59 = vadd.f32 %v1571_v46, %v1610_v40  ;;  %v1685_v60 = vpop.eup %1367  ;;  %v781_v61 = vmul.f32 1.442695, %v759_v41 }
 0x10c   : > { %2007 = vst [vmem:[#allocation3_spill] sm:$0xff] %v1674_v51  ;;  %vm490_vm8 = vcmp.ge.f32.partialorder %v1632_v3, 0.0  ;;  %v1688_v52 = vmul.f32 0.5, %v411_v6  ;;  %v1692_v63 = vadd.f32 %v1622_v53, %v1571_v46  ;;  %v1694_v0 = vpop.eup %1369  ;;  %1379 = vrcp.f32 %v552_v44 }
 0x10d   : > { %v690_v31 = vmul.f32 %v1605_v35, %v674_v17  ;;  %v762_v1 = vmul.f32 %v746_v45, %v522_v22  ;;  %v1697_v2 = vmul.f32 0.70710677, %v1683_v59  ;;  %v1699_v40 = vpop.eup %1371  ;;  %1381 = vrcp.f32 %v551_v49 }
 0x10e   : > { %2008 = vst [vmem:[#allocation4_spill] sm:$0xff] %v1692_v63  ;;  %v537_v5 = vmul.f32 0.3275911, %v521_v16  ;;  %v745_v9 = vsub.f32 0.0, %v521_v16  ;;  %v1702_v6 = vmul.f32 0.70710677, %v1692_v63  ;;  %v1704_v10 = vpop.eup %1373  ;;  %1383 = vpow2.f32 %v783_v47 }
 0x10f   : > { %v706_v13 = vadd.f32 0.2548296, %v690_v31  ;;  %v554_v53 = vadd.f32 1.0, %v538_v56  ;;  %v540_v14 = vmul.f32 0.3275911, %v524_v58  ;;  %v748_v15 = vsub.f32 0.0, %v524_v58 }
 0x110   : > { %1385 = vpow2.f32 %v781_v61  ;;  %v1709_v17 = vsel %vm490_vm8, 1.0, %v1997_v18  ;;  %vm489_vm9 = vcmp.ge.f32.partialorder %v1648_v28, 0.0  ;;  %v523_v21 = vand.u32 2147483647, %v1697_v2 }
 0x111   : > { %v722_v33 = vmul.f32 %v1605_v35, %v706_v13  ;;  %2009 = vst [vmem:[#allocation5_spill] sm:$0xff] %v1709_v17  ;;  %v1713_v22 = vpop.eup %1375  ;;  %v787_v26 = vmul.f32 1.442695, %v762_v1  ;;  %vm492_vm10 = vcmp.ge.f32.partialorder %v1657_v34, 0.0  ;;  %v526_v27 = vand.u32 2147483647, %v1702_v6 }
 0x112   : > { %v1717_v31 = vpop.eup %1377  ;;  %v553_v41 = vadd.f32 1.0, %v537_v5  ;;  %v761_v13 = vmul.f32 %v745_v9, %v521_v16  ;;  %v747_v44 = vsub.f32 0.0, %v523_v21  ;;  %v1721_v3 = vadd.f32 %v1571_v46, %v1626_v57 }
 0x113   : > { %v802_v35 = vmul.f32 %v1360_v23, %v722_v33  ;;  %1387 = vrcp.f32 %v554_v53  ;;  %v556_v45 = vadd.f32 1.0, %v540_v14  ;;  %v764_v47 = vmul.f32 %v748_v15, %v524_v58 }
 0x114   : > { %2010 = vst [vmem:[#allocation6_spill] sm:$0xff] %v1721_v3  ;;  %v1725_v49 = vadd.f32 %v1634_v4, %v1571_v46  ;;  %v1730_v33 = vsel %vm489_vm9, 1.0, %v1997_v18  ;;  %v539_v56 = vmul.f32 0.3275911, %v523_v21  ;;  %v750_v61 = vsub.f32 0.0, %v526_v27 }
 0x115   : > { %v818_v23 = vsub.f32 1.0, %v802_v35  ;;  %v1733_v16 = vmul.f32 0.70710677, %v1721_v3  ;;  %1389 = vpow2.f32 %v787_v26  ;;  %v542_v35 = vmul.f32 0.3275911, %v526_v27 }
 0x116   : > { %2011 = vst [vmem:[#allocation7_spill] sm:$0xff] %v1725_v49  ;;  %v1738_v58 = vadd.f32 %v1571_v46, %v1638_v7  ;;  %1391 = vrcp.f32 %v553_v41  ;;  %v785_v4 = vmul.f32 1.442695, %v761_v13  ;;  %v763_v1 = vmul.f32 %v747_v44, %v523_v21  ;;  %v1741_v5 = vpop.eup %1379 }
 0x117   : > { %2012 = vst [vmem:[#allocation8_spill] sm:$0xff] %v1733_v16  ;;  %v834_v57 = vmul.f32 %v818_v23, %v1586_v19  ;;  %v525_v28 = vand.u32 2147483647, %v1733_v16  ;;  %v1746_v9 = vsel %vm492_vm10, 1.0, %v1997_v18  ;;  %1393 = vrcp.f32 %v556_v45  ;;  %v1751_v14 = vpop.eup %1381 }
 0x118   : > { %2013 = vst [vmem:[#allocation9_spill] sm:$0xff] %v1738_v58  ;;  %2014 = vst [vmem:[#allocation10_spill] sm:$0xff] %v1746_v9  ;;  %v791_v19 = vmul.f32 1.442695, %v764_v47  ;;  %v1749_v53 = vmul.f32 0.70710677, %v1725_v49  ;;  %v766_v7 = vmul.f32 %v750_v61, %v526_v27  ;;  %v1754_v21 = vpop.eup %1383  ;;  %1395 = vpow2.f32 %v785_v4 }
 0x119   : > { %vm491_vm11 = vcmp.ge.f32.partialorder %v1697_v2, 0.0  ;;  %v555_v46 = vadd.f32 1.0, %v539_v56  ;;  %v749_v15 = vsub.f32 0.0, %v525_v28  ;;  %v850_v23 = vadd.f32 1.0, %v834_v57 }
 0x11a   : > { %2015 = vst [vmem:[#allocation11_spill] sm:$0xff] %v1749_v53  ;;  %v558_v26 = vadd.f32 1.0, %v542_v35  ;;  %v1757_v34 = vand.u32 2147483647, %v1749_v53  ;;  %v1760_v41 = vmul.f32 0.70710677, %v1738_v58  ;;  %v1762_v13 = vpop.eup %1385  ;;  %1397 = vpow2.f32 %v791_v19 }
 0x11b   : > { %v1765_v44 = vmul.f32 0.5, %v1683_v59  ;;  %v789_v45 = vmul.f32 1.442695, %v763_v1  ;;  %v593_v27 = vmul.f32 1.0614054, %v1640_v8  ;;  %v765_v56 = vmul.f32 %v749_v15, %v525_v28 }
 0x11c   : > { %2016 = vst [vmem:[#allocation12_spill] sm:$0xff] %v1760_v41  ;;  %v541_v47 = vmul.f32 0.3275911, %v525_v28  ;;  %v527_v61 = vand.u32 2147483647, %v1760_v41  ;;  %v1772_v57 = vsel %vm491_vm11, 1.0, %v1997_v18  ;;  %1399 = vrcp.f32 %v555_v46 }
 0x11d   : > { %2017 = vst [vmem:[#allocation13_spill] sm:$0xff] %v1765_v44  ;;  %2018 = vst [vmem:[#allocation14_spill] sm:$0xff] %v1772_v57  ;;  %v795_v35 = vmul.f32 1.442695, %v766_v7  ;;  %v609_v49 = vadd.f32 -1.4531521, %v593_v27  ;;  %v1774_v4 = vpop.eup %1387  ;;  %v1777_v59 = vmul.f32 %v850_v23, %v1579_v11  ;;  %1401 = vrcp.f32 %v558_v26 }
 0x11e   : > { %v544_v1 = vmul.f32 0.3275911, %v1757_v34  ;;  %v751_v19 = vsub.f32 0.0, %v527_v61  ;;  %1403 = vpow2.f32 %v789_v45  ;;  %v595_v15 = vmul.f32 1.0614054, %v1685_v60 }
 0x11f   : > { %v625_v28 = vmul.f32 %v1640_v8, %v609_v49  ;;  %v596_v2 = vmul.f32 1.0614054, %v1669_v42  ;;  %v1783_v18 = vpop.eup %1389  ;;  %v557_v46 = vadd.f32 1.0, %v541_v47  ;;  %v1785_v7 = vmul.f32 1.442695, %v765_v56 }
 0x120   : > { %v543_v27 = vmul.f32 0.3275911, %v527_v61  ;;  %v767_v58 = vmul.f32 %v751_v19, %v527_v61  ;;  %v1787_v11 = vpop.eup %1391  ;;  %1405 = vpow2.f32 %v795_v35  ;;  %v611_v26 = vadd.f32 -1.4531521, %v595_v15 }
 0x121   : > { %v641_v23 = vadd.f32 1.4214138, %v625_v28  ;;  %v612_v53 = vadd.f32 -1.4531521, %v596_v2  ;;  %v1789_v45 = vpop.eup %1393  ;;  %v560_v49 = vadd.f32 1.0, %v544_v1  ;;  %v752_v63 = vsub.f32 0.0, %v1757_v34 }
 0x122   : > { %v597_v44 = vmul.f32 1.0614054, %v1704_v10  ;;  %v598_v41 = vmul.f32 1.0614054, %v1699_v40  ;;  %v1794_v47 = vmul.f32 1.442695, %v767_v58  ;;  %v627_v61 = vmul.f32 %v1685_v60, %v611_v26  ;;  %v1802_v1 = vpop.eup %1395 }
 0x123   : > { %v657_v56 = vmul.f32 %v1640_v8, %v641_v23  ;;  %v628_v35 = vmul.f32 %v1669_v42, %v612_v53  ;;  %v559_v19 = vadd.f32 1.0, %v543_v27  ;;  %v1800_v2 = vmul.f32 0.5, %v1608_v39 }
 0x124   : > { %v613_v28 = vadd.f32 -1.4531521, %v597_v44  ;;  %v614_v15 = vadd.f32 -1.4531521, %v598_v41  ;;  %1407 = vrcp.f32 %v557_v46  ;;  %v643_v12 = vadd.f32 1.4214138, %v627_v61  ;;  %v1804_v58 = vpop.eup %1397 }
 0x125   : > { %v673_v3 = vadd.f32 -0.28449672, %v657_v56  ;;  %v644_v9 = vadd.f32 1.4214138, %v628_v35  ;;  %2019 = vst [vmem:[#allocation15_spill] sm:$0xff] %v1804_v58  ;;  %vm487_vm12 = vcmp.ge.f32.partialorder %v1615_v48, 0.0  ;;  %v1821_v35 = vmul.f32 %v752_v63, %v1757_v34 }
 0x126   : > { %v629_v23 = vmul.f32 %v1704_v10, %v613_v28  ;;  %v630_v26 = vmul.f32 %v1699_v40, %v614_v15  ;;  %v599_v53 = vmul.f32 1.0614054, %v1751_v14  ;;  %v1810_v41 = vpop.eup %1399  ;;  %v659_v44 = vmul.f32 %v1685_v60, %v643_v12 }
 0x127   : > { %v689_v39 = vmul.f32 %v1640_v8, %v673_v3  ;;  %v660_v46 = vmul.f32 %v1669_v42, %v644_v9  ;;  %v2020_v27 = vmov -1.0   ;;  %v1818_v61 = vpop.eup %1401  ;;  %1409 = vrcp.f32 %v560_v49 }
 0x128   : > { %v1816_v56 = vsel %vm487_vm12, 1.0, %v2020_v27  ;;  %v645_v28 = vadd.f32 1.4214138, %v629_v23  ;;  %v646_v48 = vadd.f32 1.4214138, %v630_v26  ;;  %v1823_v57 = vpop.eup %1403  ;;  %1411 = vrcp.f32 %v559_v19 }
 0x129   : > { %v615_v15 = vadd.f32 -1.4531521, %v599_v53  ;;  %v705_v51 = vadd.f32 0.2548296, %v689_v39  ;;  %v675_v3 = vadd.f32 -0.28449672, %v659_v44  ;;  %1413 = vpow2.f32 %v1785_v7 }
 0x12a   : > { %v676_v16 = vadd.f32 -0.28449672, %v660_v46  ;;  %v661_v12 = vmul.f32 %v1704_v10, %v645_v28  ;;  %v662_v9 = vmul.f32 %v1699_v40, %v646_v48  ;;  %v600_v58 = vmul.f32 1.0614054, %v1741_v5  ;;  %v1829_v17 = vpop.eup %1405 }
 0x12b   : > { %v631_v27 = vmul.f32 %v1751_v14, %v615_v15  ;;  %2021 = vst [vmem:[#allocation16_spill] sm:$0xff] %v1829_v17  ;;  %v721_v63 = vmul.f32 %v1640_v8, %v705_v51  ;;  %v691_v34 = vmul.f32 %v1685_v60, %v675_v3  ;;  %v601_v49 = vmul.f32 1.0614054, %v1787_v11 }
 0x12c   : > { %v692_v23 = vmul.f32 %v1669_v42, %v676_v16  ;;  %v677_v26 = vadd.f32 -0.28449672, %v661_v12  ;;  %v678_v53 = vadd.f32 -0.28449672, %v662_v9  ;;  %v616_v48 = vadd.f32 -1.4531521, %v600_v58 }
 0x12d   : > { %v647_v39 = vadd.f32 1.4214138, %v631_v27  ;;  %v801_v44 = vmul.f32 %v1659_v36, %v721_v63  ;;  %v707_v46 = vadd.f32 0.2548296, %v691_v34  ;;  %v617_v51 = vadd.f32 -1.4531521, %v601_v49 }
 0x12e   : > { %v708_v28 = vadd.f32 0.2548296, %v692_v23  ;;  %v693_v15 = vmul.f32 %v1704_v10, %v677_v26  ;;  %v694_v17 = vmul.f32 %v1699_v40, %v678_v53  ;;  %v1839_v3 = vpop.eup %1407  ;;  %v632_v27 = vmul.f32 %v1741_v5, %v616_v48 }
 0x12f   : > { %v663_v8 = vmul.f32 %v1751_v14, %v647_v39  ;;  %v817_v16 = vsub.f32 1.0, %v801_v44  ;;  %v723_v19 = vmul.f32 %v1685_v60, %v707_v46  ;;  %v633_v58 = vmul.f32 %v1787_v11, %v617_v51 }
 0x130   : > { %v724_v12 = vmul.f32 %v1669_v42, %v708_v28  ;;  %v709_v36 = vadd.f32 0.2548296, %v693_v15  ;;  %v710_v9 = vadd.f32 0.2548296, %v694_v17  ;;  %v648_v26 = vadd.f32 1.4214138, %v632_v27 }
 0x131   : > { %v679_v63 = vadd.f32 -0.28449672, %v663_v8  ;;  %v833_v34 = vmul.f32 %v817_v16, %v1591_v24  ;;  %v803_v23 = vmul.f32 %v1694_v0, %v723_v19  ;;  %v649_v39 = vadd.f32 1.4214138, %v633_v58  ;;  %v1851_v44 = vpop.eup %1409 }
 0x132   : > { %v804_v49 = vmul.f32 %v1677_v54, %v724_v12  ;;  %v725_v53 = vmul.f32 %v1704_v10, %v709_v36  ;;  %v726_v60 = vmul.f32 %v1699_v40, %v710_v9  ;;  %v664_v48 = vmul.f32 %v1741_v5, %v648_v26  ;;  %v1860_v16 = vpop.eup %1411 }
 0x133   : > { %v695_v42 = vmul.f32 %v1751_v14, %v679_v63  ;;  %v849_v17 = vadd.f32 1.0, %v833_v34  ;;  %v819_v46 = vsub.f32 1.0, %v803_v23  ;;  %v665_v15 = vmul.f32 %v1787_v11, %v649_v39 }
 0x134   : > { %v820_v28 = vsub.f32 1.0, %v804_v49  ;;  %v805_v24 = vmul.f32 %v1717_v31, %v725_v53  ;;  %v806_v0 = vmul.f32 %v1713_v22, %v726_v60  ;;  %v680_v51 = vadd.f32 -0.28449672, %v664_v48 }
 0x135   : > { %v711_v54 = vadd.f32 0.2548296, %v695_v42  ;;  %v865_v10 = vmul.f32 %v849_v17, %v1588_v20  ;;  %v835_v40 = vmul.f32 %v819_v46, %v1619_v50  ;;  %v681_v36 = vadd.f32 -0.28449672, %v665_v15 }
 0x136   : > { %v836_v8 = vmul.f32 %v820_v28, %v1597_v29  ;;  %v821_v19 = vsub.f32 1.0, %v805_v24  ;;  %v822_v12 = vsub.f32 1.0, %v806_v0  ;;  %v696_v9 = vmul.f32 %v1741_v5, %v680_v51 }
 0x137   : > { %v727_v27 = vmul.f32 %v1751_v14, %v711_v54  ;;  %1266 = vmatprep.mubr.f32.mxu0 %v865_v10  ;;  %v851_v31 = vadd.f32 1.0, %v835_v40  ;;  %v602_v63 = vmul.f32 1.0614054, %v1774_v4  ;;  %v697_v58 = vmul.f32 %v1787_v11, %v681_v36 }
 0x138   : > { %v852_v22 = vadd.f32 1.0, %v836_v8  ;;  %1267 = vmatmul.mubr.f32.vlgmr.msra.gmra.mrb[16].mxu0 %v1777_v59  ;;  %v837_v20 = vmul.f32 %v821_v19, %v1664_v37  ;;  %v838_v29 = vmul.f32 %v822_v12, %v1654_v32  ;;  %v712_v23 = vadd.f32 0.2548296, %v696_v9 }
 0x139   : > { %v807_v50 = vmul.f32 %v1762_v13, %v727_v27  ;;  %v867_v14 = vmul.f32 %v851_v31, %v1599_v30  ;;  %v618_v49 = vadd.f32 -1.4531521, %v602_v63  ;;  %v713_v42 = vadd.f32 0.2548296, %v697_v58 }
 0x13a   : > { %v868_v34 = vmul.f32 %v852_v22, %v1593_v25  ;;  %v853_v26 = vadd.f32 1.0, %v837_v20  ;;  %v854_v53 = vadd.f32 1.0, %v838_v29  ;;  %v728_v59 = vmul.f32 %v1741_v5, %v712_v23 }
 0x13b   : > { %v823_v60 = vsub.f32 1.0, %v807_v50  ;;  %1269 = vmatprep.mubr.f32.mxu0 %v867_v14  ;;  %v634_v37 = vmul.f32 %v1774_v4, %v618_v49  ;;  %v603_v32 = vmul.f32 1.0614054, %v1810_v41  ;;  %v604_v13 = vmul.f32 1.0614054, %v1789_v45 }
 0x13c   : > { %1270 = vmatmul.mubr.f32.gmra.mrb[18].mxu0 %v868_v34  ;;  %v869_v30 = vmul.f32 %v853_v26, %v1629_v62  ;;  %v870_v25 = vmul.f32 %v854_v53, %v1624_v55  ;;  %v729_v17 = vmul.f32 %v1787_v11, %v713_v42  ;;  %v808_v46 = vmul.f32 %v1754_v21, %v728_v59 }
 0x13d   : > { %v839_v39 = vmul.f32 %v823_v60, %v1816_v56  ;;  %v650_v28 = vadd.f32 1.4214138, %v634_v37  ;;  %v619_v48 = vadd.f32 -1.4531521, %v603_v32  ;;  %v620_v5 = vadd.f32 -1.4531521, %v604_v13 }
 0x13e   : > { %1272 = vmatprep.mubr.f32.mxu0 %v869_v30  ;;  %v809_v0 = vmul.f32 %v1802_v1, %v729_v17  ;;  %v605_v54 = vmul.f32 1.0614054, %v1839_v3  ;;  %v606_v15 = vmul.f32 1.0614054, %v1818_v61  ;;  %v824_v62 = vsub.f32 1.0, %v808_v46 }
 0x13f   : > { %v855_v24 = vadd.f32 1.0, %v839_v39  ;;  %v666_v55 = vmul.f32 %v1774_v4, %v650_v28  ;;  %v635_v56 = vmul.f32 %v1810_v41, %v619_v48  ;;  %v636_v11 = vmul.f32 %v1789_v45, %v620_v5 }
 0x140   : > { %1273 = vmatmul.mubr.f32.gmra.mrb[20].mxu0 %v870_v25  ;;  %v825_v10 = vsub.f32 1.0, %v809_v0  ;;  %v621_v40 = vadd.f32 -1.4531521, %v605_v54  ;;  %v622_v8 = vadd.f32 -1.4531521, %v606_v15  ;;  %v840_v51 = vmul.f32 %v824_v62, %v1672_v43  ;;  %v2022_v54 = vld [vmem:[#allocation5_spill] sm:$0xff] }
 0x141   : > { %v871_v21 = vmul.f32 %v855_v24, %v1800_v2  ;;  %v682_v1 = vadd.f32 -0.28449672, %v666_v55  ;;  %v651_v19 = vadd.f32 1.4214138, %v635_v56  ;;  %v652_v12 = vadd.f32 1.4214138, %v636_v11  ;;  %v1414_v11 = vpop.eup %1413 }
 0x142   : > { %v841_v27 = vmul.f32 %v825_v10, %v1730_v33  ;;  %v637_v36 = vmul.f32 %v1839_v3, %v621_v40  ;;  %v638_v31 = vmul.f32 %v1818_v61, %v622_v8  ;;  %v607_v22 = vmul.f32 1.0614054, %v1860_v16  ;;  %v2023_v62 = vld [vmem:[#allocation15_spill] sm:$0xff] }
 0x143   : > { %1275 = vmatprep.mubr.f32.mxu1 %v871_v21  ;;  %v856_v9 = vadd.f32 1.0, %v840_v51  ;;  %v698_v2 = vmul.f32 %v1774_v4, %v682_v1  ;;  %v667_v63 = vmul.f32 %v1810_v41, %v651_v19  ;;  %v668_v20 = vmul.f32 %v1789_v45, %v652_v12  ;;  %v2024_v1 = vld [vmem:[#allocation8_spill] sm:$0xff] }
 0x144   : > { %v857_v43 = vadd.f32 1.0, %v841_v27  ;;  %v653_v29 = vadd.f32 1.4214138, %v637_v36  ;;  %v654_v50 = vadd.f32 1.4214138, %v638_v31  ;;  %1415 = vpow2.f32 %v1794_v47  ;;  %v2025_v12 = vld [vmem:[#allocation16_spill] sm:$0xff] }
 0x145   : > { %v872_v33 = vmul.f32 %v856_v9, %v1667_v38  ;;  %v714_v58 = vadd.f32 0.2548296, %v698_v2  ;;  %v683_v14 = vadd.f32 -0.28449672, %v667_v63  ;;  %v684_v34 = vadd.f32 -0.28449672, %v668_v20 }
 0x146   : > { %v873_v23 = vmul.f32 %v857_v43, %v1688_v52  ;;  %v669_v49 = vmul.f32 %v1839_v3, %v653_v29  ;;  %v670_v26 = vmul.f32 %v1818_v61, %v654_v50  ;;  %v623_v53 = vadd.f32 -1.4531521, %v607_v22  ;;  %v2026_v36 = vld [vmem:[#allocation3_spill] sm:$0xff]  ;;  %v2027_v22 = vld [vmem:[#allocation14_spill] sm:$0xff] }
 0x147   : > { %1276 = vmatmul.mubr.f32.vlgmr.msra.gmra.mrb[0].mxu1 %v872_v33  ;;  %v730_v60 = vmul.f32 %v1774_v4, %v714_v58  ;;  %v699_v7 = vmul.f32 %v1810_v41, %v683_v14  ;;  %v700_v42 = vmul.f32 %v1789_v45, %v684_v34  ;;  %v608_v59 = vmul.f32 1.0614054, %v1851_v44 }
 0x148   : > { %v799_v38 = vmul.f32 1.442695, %v1821_v35  ;;  %1278 = vmatprep.mubr.f32.mxu1 %v873_v23  ;;  %v685_v37 = vadd.f32 -0.28449672, %v669_v49  ;;  %v686_v32 = vadd.f32 -0.28449672, %v670_v26  ;;  %v639_v52 = vmul.f32 %v1860_v16, %v623_v53 }
 0x149   : > { %v810_v13 = vmul.f32 %v1783_v18, %v730_v60  ;;  %v715_v30 = vadd.f32 0.2548296, %v699_v7  ;;  %v716_v25 = vadd.f32 0.2548296, %v700_v42  ;;  %v624_v39 = vadd.f32 -1.4531521, %v608_v59 }
 0x14a   : > { %v701_v4 = vmul.f32 %v1839_v3, %v685_v37  ;;  %v702_v17 = vmul.f32 %v1818_v61, %v686_v32  ;;  %v655_v46 = vadd.f32 1.4214138, %v639_v52  ;;  %vm494_vm13 = vcmp.ge.f32.partialorder %v1702_v6, 0.0  ;;  %v2030_v49 = vld [vmem:[#allocation2_spill] sm:$0xff]  ;;  %v2032_v59 = vld [vmem:[#allocation12_spill] sm:$0xff] }
 0x14b   : > { %v826_v28 = vsub.f32 1.0, %v810_v13  ;;  %v731_v35 = vmul.f32 %v1810_v41, %v715_v30  ;;  %v732_v48 = vmul.f32 %v1789_v45, %v716_v25  ;;  %v640_v5 = vmul.f32 %v1851_v44, %v624_v39  ;;  %v2031_v42 = vld [vmem:[#allocation6_spill] sm:$0xff] }
 0x14c   : > { %v717_v18 = vadd.f32 0.2548296, %v701_v4  ;;  %v718_v24 = vadd.f32 0.2548296, %v702_v17  ;;  %v671_v0 = vmul.f32 %v1860_v16, %v655_v46  ;;  %1417 = vpow2.f32 %v799_v38  ;;  %v2033_v38 = vld [vmem:[#allocation13_spill] sm:$0xff]  ;;  %v2034_v17 = vld [vmem:[#allocation4_spill] sm:$0xff] }
 0x14d   : > { %v842_v47 = vmul.f32 %v826_v28, %v2022_v54  ;;  %v811_v15 = vmul.f32 %v1823_v57, %v731_v35  ;;  %v812_v55 = vmul.f32 %v2023_v62, %v732_v48  ;;  %v656_v56 = vadd.f32 1.4214138, %v640_v5  ;;  %v2035_v35 = vld [vmem:[#allocation11_spill] sm:$0xff] }
 0x14e   : > { %v733_v41 = vmul.f32 %v1839_v3, %v717_v18  ;;  %v734_v45 = vmul.f32 %v1818_v61, %v718_v24  ;;  %v687_v21 = vadd.f32 -0.28449672, %v671_v0  ;;  %vm493_vm14 = vcmp.ge.f32.partialorder %v2024_v1, 0.0  ;;  %v2028_v3 = vld [vmem:[#allocation10_spill] sm:$0xff]  ;;  %v1416_v23 = vpop.eup %1415 }
 0x14f   : > { %v858_v10 = vadd.f32 1.0, %v842_v47  ;;  %v827_v40 = vsub.f32 1.0, %v811_v15  ;;  %v828_v8 = vsub.f32 1.0, %v812_v55  ;;  %v672_v51 = vmul.f32 %v1851_v44, %v656_v56  ;;  %v2036_v47 = vld [vmem:[#allocation9_spill] sm:$0xff]  ;;  %v2037_v56 = vld [vmem:[#allocation7_spill] sm:$0xff] }
 0x150   : > { %v813_v19 = vmul.f32 %v1414_v11, %v733_v41  ;;  %v814_v57 = vmul.f32 %v2025_v12, %v734_v45  ;;  %v703_v27 = vmul.f32 %v1860_v16, %v687_v21  ;;  %v2029_v63 = vmov -1.0   ;;  %v1147_v21 = vld [vmem:[%s1994_s4] ss:$0 sm:$0xff] }
 0x151   : > { %v874_v31 = vmul.f32 %v858_v10, %v2026_v36  ;;  %v843_v9 = vmul.f32 %v827_v40, %v2027_v22  ;;  %v844_v2 = vmul.f32 %v828_v8, %v2028_v3  ;;  %v688_v61 = vadd.f32 -0.28449672, %v672_v51 }
 0x152   : > { %v510_v20 = vsel %vm494_vm13, 1.0, %v2029_v63  ;;  %v829_v43 = vsub.f32 1.0, %v813_v19  ;;  %v830_v29 = vsub.f32 1.0, %v814_v57  ;;  %v719_v50 = vadd.f32 0.2548296, %v703_v27 }
 0x153   : > { %v509_v33 = vsel %vm493_vm14, 1.0, %v2029_v63  ;;  %1279 = vmatmul.mubr.f32.gmra.mrb[2].mxu1 %v874_v31  ;;  %v859_v58 = vadd.f32 1.0, %v843_v9  ;;  %v860_v14 = vadd.f32 1.0, %v844_v2  ;;  %v704_v34 = vmul.f32 %v1851_v44, %v688_v61 }
 0x154   : > { %v460_v26 = vmul.f32 0.5, %v2030_v49  ;;  %v845_v53 = vmul.f32 %v829_v43, %v509_v33  ;;  %v846_v60 = vmul.f32 %v830_v29, %v510_v20  ;;  %v735_v7 = vmul.f32 %v1860_v16, %v719_v50 }
 0x155   : > { %v461_v6 = vmul.f32 0.5, %v2031_v42  ;;  %vm495_vm15 = vcmp.ge.f32.partialorder %v2032_v59, 0.0  ;;  %v875_v37 = vmul.f32 %v859_v58, %v2033_v38  ;;  %v720_v32 = vadd.f32 0.2548296, %v704_v34 }
 0x156   : > { %v876_v52 = vmul.f32 %v860_v14, %v460_v26  ;;  %v861_v13 = vadd.f32 1.0, %v845_v53  ;;  %v862_v30 = vadd.f32 1.0, %v846_v60  ;;  %v815_v25 = vmul.f32 %v1416_v23, %v735_v7  ;;  %v1418_v4 = vpop.eup %1417 }
 0x157   : > { %1281 = vmatprep.mubr.f32.mxu1 %v875_v37  ;;  %v736_v39 = vmul.f32 %v1851_v44, %v720_v32  ;;  %v462_v46 = vmul.f32 0.5, %v2034_v17  ;;  %vm496_vm1 = vcmp.ge.f32.partialorder %v2035_v35, 0.0  ;;  %v511_v48 = vsel %vm495_vm15, 1.0, %v2029_v63 }
 0x158   : > { %1282 = vmatmul.mubr.f32.gmra.mrb[4].mxu1 %v876_v52  ;;  %v877_v28 = vmul.f32 %v861_v13, %v461_v6  ;;  %v831_v16 = vsub.f32 1.0, %v815_v25  ;;  %v512_v54 = vsel %vm496_vm1, 1.0, %v2029_v63  ;;  %v463_v44 = vmul.f32 0.5, %v2036_v47 }
 0x159   : > { %v816_v5 = vmul.f32 %v1418_v4, %v736_v39  ;;  %v878_v18 = vmul.f32 %v862_v30, %v462_v46  ;;  %v464_v11 = vmul.f32 0.5, %v2037_v56 }
 0x15a   : > { %1284 = vmatprep.mubr.f32.mxu1 %v877_v28  ;;  %v847_v24 = vmul.f32 %v831_v16, %v511_v48 }
 0x15b   : > { %v832_v0 = vsub.f32 1.0, %v816_v5 }
 0x15c   : > { %1285 = vmatmul.mubr.f32.gmra.mrb[6].mxu1 %v878_v18  ;;  %v863_v15 = vadd.f32 1.0, %v847_v24 }
 0x15d   : > { %v848_v62 = vmul.f32 %v832_v0, %v512_v54 }
 0x15e   : > { %v879_v55 = vmul.f32 %v863_v15, %v463_v44 }
 0x15f   : > { %v864_v41 = vadd.f32 1.0, %v848_v62 }
 0x160   : > { %1287 = vmatprep.mubr.f32.mxu1 %v879_v55 }
 0x161   : > { %v880_v45 = vmul.f32 %v864_v41, %v464_v11 }
 0x163   : > { %1288 = vmatmul.mubr.f32.gmra.mrb[8].mxu1 %v880_v45 }
 0x20b   : > { %v1268_v10 = vpop.f32.mrb[16].mxu0 }
 0x20c   : > { %v976_v40 = vadd.f32 %v1268_v10, %v1147_v21  ;;  %v970_v8 = vpop.f32.mrb[17].mxu0 }
 0x20d   : > { %v971_v51 = vadd.f32 %v1147_v21, %v970_v8 }
 0x20e   : > { %1050 = vst.msk [vmem:[%s1953_s25 + $0x8] sm:$0xff] %vm255_vm0, %v976_v40 }
 0x20f   : > { %1049 = vst.msk [vmem:[%s1953_s25] sm:$0xff] %vm255_vm0, %v971_v51  ;;  %v1271_v1 = vpop.f32.mrb[18].mxu0 }
 0x210   : > { %v986_v19 = vadd.f32 %v1271_v1, %v1147_v21  ;;  %v980_v12 = vpop.f32.mrb[19].mxu0 }
 0x211   : > { %v981_v57 = vadd.f32 %v1147_v21, %v980_v12 }
 0x212   : > { %1052 = vst.msk [vmem:[%s1953_s25 + $0x18] sm:$0xff] %vm255_vm0, %v986_v19 }
 0x213   : > { %1051 = vst.msk [vmem:[%s1953_s25 + $0x10] sm:$0xff] %vm255_vm0, %v981_v57  ;;  %v1274_v27 = vpop.f32.mrb[20].mxu0 }
 0x214   : > { %v996_v36 = vadd.f32 %v1274_v27, %v1147_v21  ;;  %v990_v31 = vpop.f32.mrb[21].mxu0 }
 0x215   : > { %v991_v22 = vadd.f32 %v1147_v21, %v990_v31 }
 0x216   : > { %1054 = vst.msk [vmem:[%s1953_s25 + $0x28] sm:$0xff] %vm255_vm0, %v996_v36 }
 0x217   : > { %1053 = vst.msk [vmem:[%s1953_s25 + $0x20] sm:$0xff] %vm255_vm0, %v991_v22 }
 0x21a   : > { %v1277_v9 = vpop.f32.mrb[0].mxu1 }
 0x21b   : > { %v1006_v3 = vadd.f32 %v1277_v9, %v1147_v21  ;;  %v1000_v2 = vpop.f32.mrb[1].mxu1 }
 0x21c   : > { %v1001_v61 = vadd.f32 %v1147_v21, %v1000_v2 }
 0x21d   : > { %1056 = vst.msk [vmem:[%s1953_s25 + $0x38] sm:$0xff] %vm255_vm0, %v1006_v3 }
 0x21e   : > { %1055 = vst.msk [vmem:[%s1953_s25 + $0x30] sm:$0xff] %vm255_vm0, %v1001_v61 }
 0x226   : > { %v1280_v63 = vpop.f32.mrb[2].mxu1 }
 0x227   : > { %v1016_v20 = vadd.f32 %v1280_v63, %v1147_v21  ;;  %v1010_v43 = vpop.f32.mrb[3].mxu1 }
 0x228   : > { %v1011_v29 = vadd.f32 %v1147_v21, %v1010_v43 }
 0x229   : > { %1058 = vst.msk [vmem:[%s1953_s25 + $0x48] sm:$0xff] %vm255_vm0, %v1016_v20 }
 0x22a   : > { %1057 = vst.msk [vmem:[%s1953_s25 + $0x40] sm:$0xff] %vm255_vm0, %v1011_v29 }
 0x22b   : > { %v1283_v50 = vpop.f32.mrb[4].mxu1 }
 0x22c   : > { %v1026_v33 = vadd.f32 %v1283_v50, %v1147_v21  ;;  %v1020_v58 = vpop.f32.mrb[5].mxu1 }
 0x22d   : > { %v1021_v14 = vadd.f32 %v1147_v21, %v1020_v58 }
 0x22e   : > { %1060 = vst.msk [vmem:[%s1953_s25 + $0x58] sm:$0xff] %vm255_vm0, %v1026_v33 }
 0x22f   : > { %1059 = vst.msk [vmem:[%s1953_s25 + $0x50] sm:$0xff] %vm255_vm0, %v1021_v14  ;;  %v1286_v34 = vpop.f32.mrb[6].mxu1 }
 0x230   : > { %v1036_v23 = vadd.f32 %v1286_v34, %v1147_v21  ;;  %v1030_v49 = vpop.f32.mrb[7].mxu1 }
 0x231   : > { %v1031_v26 = vadd.f32 %v1147_v21, %v1030_v49 }
 0x232   : > { %1062 = vst.msk [vmem:[%s1953_s25 + $0x68] sm:$0xff] %vm255_vm0, %v1036_v23 }
 0x233   : > { %1061 = vst.msk [vmem:[%s1953_s25 + $0x60] sm:$0xff] %vm255_vm0, %v1031_v26 }
 0x236   : > { %v1289_v53 = vpop.f32.mrb[8].mxu1 }
 0x237   : > { %v1046_v60 = vadd.f32 %v1289_v53, %v1147_v21  ;;  %v1040_v7 = vpop.f32.mrb[9].mxu1 }
 0x238   : > { %v1041_v42 = vadd.f32 %v1147_v21, %v1040_v7 }
 0x239   : > { %1064 = vst.msk [vmem:[%s1953_s25 + $0x78] sm:$0xff] %vm255_vm0, %v1046_v60 }
 0x23a   : > { %1063 = vst.msk [vmem:[%s1953_s25 + $0x70] sm:$0xff] %vm255_vm0, %v1041_v42 }
 0x23b PF: > { %s15_s18 = sadd.s32 1, %s1425_s18  }
 0x23c   : > { %p12_p4 = scmp.ge.s32.totalorder %s15_s18, 4  }
 0x23e   :  { %14 = sbr.rel (!%p12_p4) target bundleno = 1 (0x1), region = 70 }

</bundles_post_ra>
